<compile_context>
chip_gen: v5e
topology: v5e:2x2
jax: 0.10.0
libtpu: 0.0.40
codegen_flags: <defaults>
</compile_context>

<pallas_src>
import jax
import jax.numpy as jnp
from jax.experimental import pallas as pl
from jax.experimental.pallas import tpu as pltpu


def _round_up(x, m):
    return ((x + m - 1) // m) * m


def _w2v_matmul_kernel(h_ref, w_ref, out_ref):
    # (TM, E_pad) @ (E_pad, TN) on the MXU; f32 accumulation, cast at the store.
    out_ref[...] = jnp.dot(
        h_ref[...], w_ref[...], preferred_element_type=jnp.float32
    ).astype(out_ref.dtype)


def _make_resident_weight_kernel(tn):
    # Weight is fully VMEM-resident; slice the current vocab tile in-kernel.
    def kernel(h_ref, w_ref, out_ref):
        j = pl.program_id(1)
        start = pl.multiple_of(j * tn, 128)
        w_tile = w_ref[:, pl.ds(start, tn)]
        out_ref[...] = jnp.dot(
            h_ref[...], w_tile, preferred_element_type=jnp.float32
        ).astype(out_ref.dtype)

    return kernel


def setup_word2vec_params(
    embed_table, expand_weight, *, compute_dtype=jnp.float32, vocab_tile=512
):
    """One-time parameter preparation (hoisted off the per-call path).

    embed_table   : (V, E) — nn.Embedding.weight
    expand_weight : (V, E) — nn.Linear(E, V, bias=False).weight

    Returns a dict with:
      embed : (V, E_pad)      cast to compute_dtype, E zero-padded to a 128 multiple
      w_ev  : (E_pad, V_pad)  transposed, cast, E/V zero-padded (V to a tile multiple)
      vocab_size, vocab_tile
    """
    V, E = embed_table.shape
    assert expand_weight.shape == (V, E)

    e_pad = _round_up(E, 128)
    tn = _round_up(min(int(vocab_tile), _round_up(V, 128)), 128)
    v_pad = _round_up(V, tn)

    emb = embed_table.astype(compute_dtype)
    if e_pad != E:
        emb = jnp.pad(emb, ((0, 0), (0, e_pad - E)))

    w_ev = jnp.asarray(expand_weight.T, dtype=compute_dtype)  # (E, V)
    if e_pad != E or v_pad != V:
        w_ev = jnp.pad(w_ev, ((0, e_pad - E), (0, v_pad - V)))

    return {
        "embed": emb,
        "w_ev": w_ev,
        "vocab_size": V,
        "vocab_tile": tn,
    }


def word2vec_forward(
    indices,
    params,
    *,
    tm=512,
    out_dtype=jnp.float32,
    weight_resident=False,
    vmem_limit_bytes=None,
):
    """logits[b, s, :] = embed[indices[b, s]] @ W_ev  (PyTorch Word2Vec.forward)."""
    emb = params["embed"]            # (V, E_pad), compute dtype
    w_ev = params["w_ev"]            # (E_pad, V_pad), compute dtype
    V = params["vocab_size"]
    tn = params["vocab_tile"]
    e_pad = emb.shape[1]
    v_pad = w_ev.shape[1]

    B, S = indices.shape
    N = B * S

    # Embedding gather in the wrapper (dense XLA gather). Output is already in the
    # compute dtype — no per-call cast of anything.
    # TODO(synk): optionally fuse this gather into the kernel (scalar-prefetched
    # indices + DMA gather from an ANY-space table) to skip the (N, E) HBM round trip.
    hidden = jnp.take(emb, indices.reshape(N).astype(jnp.int32), axis=0)  # (N, E_pad)

    # Token tile: clamp to the (16-aligned) problem size so small calls stay one block.
    tm_eff = _round_up(min(int(tm), _round_up(N, 16)), 16)
    n_pad = _round_up(N, tm_eff)
    if n_pad != N:
        hidden = jnp.pad(hidden, ((0, n_pad - N), (0, 0)))

    grid = (n_pad // tm_eff, v_pad // tn)

    if weight_resident:
        # v5e/v6e option: weight DMA'd once per call (constant block index).
        kernel = _make_resident_weight_kernel(tn)
        w_spec = pl.BlockSpec((e_pad, v_pad), lambda i, j: (0, 0))
    else:
        # Default (and v7x) path: stream (E_pad, TN) vocab tiles.
        kernel = _w2v_matmul_kernel
        w_spec = pl.BlockSpec((e_pad, tn), lambda i, j: (0, j))

    logits_flat = pl.pallas_call(
        kernel,
        out_shape=jax.ShapeDtypeStruct((n_pad, v_pad), out_dtype),
        grid_spec=pltpu.PrefetchScalarGridSpec(
            num_scalar_prefetch=0,
            grid=grid,
            in_specs=[
                pl.BlockSpec((tm_eff, e_pad), lambda i, j: (i, 0)),
                w_spec,
            ],
            out_specs=pl.BlockSpec((tm_eff, tn), lambda i, j: (i, j)),
        ),
        compiler_params=pltpu.CompilerParams(
            # Both axes independent -> megacore sharding on v7x.
            dimension_semantics=("parallel", "parallel"),
            vmem_limit_bytes=vmem_limit_bytes,
        ),
    )(hidden, w_ev)

    logits = logits_flat
    if n_pad != N:
        logits = logits[:N]
    if v_pad != V:
        # TODO(synk): standard vocab padding at model setup (v_pad == V) or downstream
        # masking avoids this non-contiguous slice copy of the full logits tensor.
        logits = logits[:, :V]
    return logits.reshape(B, S, V)


if __name__ == "__main__":
    # Small, PyTorch-consistent shapes: Word2Vec(vocab_size=128, embedding_size=32).
    B, S = 2, 8
    V, E = 128, 32

    key = jax.random.PRNGKey(0)
    k_idx, k_emb, k_lin = jax.random.split(key, 3)

    indices = jax.random.randint(k_idx, (B, S), 0, V, dtype=jnp.int32)
    embed_table = jax.random.normal(k_emb, (V, E), dtype=jnp.float32)          # ~ N(0, 1)
    bound = 1.0 / (E ** 0.5)
    expand_weight = jax.random.uniform(
        k_lin, (V, E), dtype=jnp.float32, minval=-bound, maxval=bound
    )

    # Pure-JAX reference: hidden = embed[idx]; logits = hidden @ W^T
    ref = jnp.take(embed_table, indices, axis=0) @ expand_weight.T

    # --- f32 path: bit-accurate semantics vs. the PyTorch module ------------------
    params_f32 = setup_word2vec_params(embed_table, expand_weight,
                                       compute_dtype=jnp.float32)
    logits = jax.block_until_ready(word2vec_forward(indices, params_f32))
    assert logits.shape == (B, S, V)
    assert jnp.allclose(logits, ref, atol=1e-5, rtol=1e-5)

    # --- bf16 compute + bf16 logits fast path (halves weight DMA and writeback) ---
    params_bf16 = setup_word2vec_params(embed_table, expand_weight,
                                        compute_dtype=jnp.bfloat16)
    logits_bf16 = jax.block_until_ready(
        word2vec_forward(indices, params_bf16, out_dtype=jnp.bfloat16)
    )
    assert logits_bf16.shape == (B, S, V)
    assert logits_bf16.dtype == jnp.bfloat16
    assert jnp.allclose(logits_bf16.astype(jnp.float32), ref, atol=1e-1, rtol=1e-1)

    # --- fully VMEM-resident weight path (v5e/v6e when the weight fits) -----------
    logits_res = jax.block_until_ready(
        word2vec_forward(
            indices, params_f32, weight_resident=True,
            vmem_limit_bytes=64 * 1024 * 1024,
        )
    )
    assert jnp.allclose(logits_res, ref, atol=1e-5, rtol=1e-5)

    print("KERNEL_OK")
</pallas_src>

<mosaic_0001>
module attributes {stable_mosaic.version = 11 : i64} {
  func.func @_w2v_matmul_kernel(%arg0: i32, %arg1: i32, %arg2: memref<16x128xf32, #tpu.memory_space<vmem>>, %arg3: memref<128x128xf32, #tpu.memory_space<vmem>>, %arg4: memref<16x128xf32, #tpu.memory_space<vmem>>) attributes {dimension_semantics = [#tpu.dimension_semantics<parallel>, #tpu.dimension_semantics<parallel>], iteration_bounds = array<i64: 1, 1>, scalar_prefetch = 0 : i64, scratch_operands = 0 : i64, tpu.core_type = #tpu.core_type<tc>, window_params = [{transform_indices = @transform_0, window_bounds = array<i64: 16, 128>}, {transform_indices = @transform_1, window_bounds = array<i64: 128, 128>}, {transform_indices = @transform_2, window_bounds = array<i64: 16, 128>}]} {
    %c0 = arith.constant 0 : index
    %c0_0 = arith.constant 0 : index
    %0 = vector.load %arg2[%c0, %c0_0] : memref<16x128xf32, #tpu.memory_space<vmem>>, vector<16x128xf32>
    %c0_1 = arith.constant 0 : index
    %c0_2 = arith.constant 0 : index
    %1 = vector.load %arg3[%c0_1, %c0_2] : memref<128x128xf32, #tpu.memory_space<vmem>>, vector<128x128xf32>
    %cst = arith.constant dense<0.000000e+00> : vector<16x128xf32>
    %2 = tpu.matmul %0, %1, %cst {dimension_numbers = #tpu.dot_dimension_numbers<[1], [0], [0], [1], [0, 0, 1, 1], [], []>} : vector<16x128xf32>, vector<128x128xf32>, vector<16x128xf32> -> vector<16x128xf32>
    %c0_3 = arith.constant 0 : index
    %c0_4 = arith.constant 0 : index
    %3 = vector.load %arg4[%c0_3, %c0_4] : memref<16x128xf32, #tpu.memory_space<vmem>>, vector<16x128xf32>
    tpu.vector_store %arg4[%c0_3, %c0_4], %2 {strides = array<i32>} : memref<16x128xf32, #tpu.memory_space<vmem>>, vector<16x128xf32>,
    return
  }
  func.func @transform_0(%arg0: i32, %arg1: i32) -> (i32, i32) {
    %c0_i32 = arith.constant 0 : i32
    %c0_i32_0 = arith.constant 0 : i32
    return %arg0, %c0_i32 : i32, i32
  }
  func.func @transform_1(%arg0: i32, %arg1: i32) -> (i32, i32) {
    %c0_i32 = arith.constant 0 : i32
    %c0_i32_0 = arith.constant 0 : i32
    return %c0_i32, %arg1 : i32, i32
  }
  func.func @transform_2(%arg0: i32, %arg1: i32) -> (i32, i32) {
    %c0_i32 = arith.constant 0 : i32
    return %arg0, %arg1 : i32, i32
  }
}

</mosaic_0001>

<bundles_post_ra>
// kernel: tpu_custom_call.1
= control target key start
LH: loop header
LB: loop body
LE: loop exit
PB: predicated region body
PF: predicated region fallthrough
CT: control target
= control target key end

     0   :  { %7 = vsyncpa [#allocation3], 0  ;;  %s244_s0 = inlined_call_operand.hbm [shape: f32[16,128], index: 0, kind: input, shape index: {}]   ;;  %s245_s1 = inlined_call_operand.hbm [shape: f32[128,128], index: 1, kind: input, shape index: {}]   ;;  %s246_s2 = inlined_call_operand.hbm [shape: f32[16,128], index: 2, kind: output, shape index: {}]  }
   0x1   :  { %8 = vsyncpa [#allocation6], 0 }
   0x2   :  { %9 = vsyncpa [#allocation4], 0  ;;  %s14_s11 = sshll.u32 %s244_s0, 4  ;;  %s206_s12 = smov [#allocation2]   ;;  %s15_s11 = int_to_ptr.hbm [resolvable:$true] %s14_s11 }
   0x3   :  { %s16_s13 = sshll.u32 %s206_s12, 4  ;;  %s27_s16 = sshll.u32 %s245_s1, 4  ;;  %s17_s13 = int_to_ptr.vmem [resolvable:$true] %s16_s13  ;;  %s28_s16 = int_to_ptr.hbm [resolvable:$true] %s27_s16 }
   0x4   :  { %s207_s17 = smov 128   ;;  %s208_s18 = smov 8  }
   0x5   :  { %22 = dma.hbm_to_vmem [thread:$0]  %s15_s11, 256, %s17_s13, [#allocation3], %s207_s17, %s207_s17, %s208_s18  }
   0x6   :  { %s209_s19 = smov [#allocation5]  }
   0x7   :  { %s29_s20 = sshll.u32 %s209_s19, 4  ;;  %s30_s20 = int_to_ptr.vmem [resolvable:$true] %s29_s20 }
   0x8   :  { %35 = dma.hbm_to_vmem [thread:$0]  %s28_s16, 2048, %s30_s20, [#allocation6], %s207_s17, %s207_s17, %s208_s18  }
   0x9   :  { %200 = dma.done.wait [#allocation3], 256  }
   0xa   :  { %201 = vsyncadd [#allocation3], 4294967040 }
   0xb   :  { %202 = dma.done.wait [#allocation6], 2048  }
   0xc   :  { %203 = vsyncadd [#allocation6], 4294965248  ;;  %v61_v0 = vld [vmem:[#allocation5 + $0x78] sm:$0xff]  ;;  %v60_v1 = vld [vmem:[#allocation5 + $0x70] sm:$0xff]  ;;  %s210_s0 = smov [#allocation7]   ;;  %s93_s23 = sshll.u32 %s246_s2, 4  ;;  %s94_s23 = int_to_ptr.hbm [resolvable:$true] %s93_s23 }
   0xd   :  { %62 = vmatpush.msra.mxu0 %v61_v0  ;;  %107 = vmatpush.msra.mxu1 %v61_v0  ;;  %v59_v2 = vld [vmem:[#allocation5 + $0x68] sm:$0xff]  ;;  %v58_v3 = vld [vmem:[#allocation5 + $0x60] sm:$0xff]  ;;  %v57_v4 = vld [vmem:[#allocation5 + $0x58] sm:$0xff]  ;;  %s91_s1 = sshll.u32 %s210_s0, 4  ;;  %s92_s1 = int_to_ptr.vmem [resolvable:$true] %s91_s1 }
   0xe   :  { %v56_v5 = vld [vmem:[#allocation5 + $0x50] sm:$0xff]  ;;  %v55_v6 = vld [vmem:[#allocation5 + $0x48] sm:$0xff]  ;;  %v54_v7 = vld [vmem:[#allocation5 + $0x40] sm:$0xff] }
   0xf   :  { %63 = vmatpush.msra.mxu0 %v60_v1  ;;  %108 = vmatpush.msra.mxu1 %v60_v1  ;;  %v53_v8 = vld [vmem:[#allocation5 + $0x38] sm:$0xff]  ;;  %v52_v9 = vld [vmem:[#allocation5 + $0x30] sm:$0xff]  ;;  %v51_v10 = vld [vmem:[#allocation5 + $0x28] sm:$0xff] }
  0x10   :  { %v50_v11 = vld [vmem:[#allocation5 + $0x20] sm:$0xff]  ;;  %v49_v12 = vld [vmem:[#allocation5 + $0x18] sm:$0xff]  ;;  %v48_v13 = vld [vmem:[#allocation5 + $0x10] sm:$0xff] }
  0x11   :  { %64 = vmatpush.msra.mxu0 %v59_v2  ;;  %109 = vmatpush.msra.mxu1 %v59_v2  ;;  %v47_v14 = vld [vmem:[#allocation5 + $0x8] sm:$0xff]  ;;  %v46_v15 = vld [vmem:[#allocation5] sm:$0xff]  ;;  %v44_v16 = vld [vmem:[#allocation2] sm:$0xff] }
  0x12   :  { %v45_v17 = vld [vmem:[#allocation2 + $0x8] sm:$0xff] }
  0x13   :  { %65 = vmatpush.msra.mxu0 %v58_v3  ;;  %110 = vmatpush.msra.mxu1 %v58_v3 }
  0x15   :  { %66 = vmatpush.msra.mxu0 %v57_v4  ;;  %111 = vmatpush.msra.mxu1 %v57_v4 }
  0x17   :  { %67 = vmatpush.msra.mxu0 %v56_v5  ;;  %112 = vmatpush.msra.mxu1 %v56_v5 }
  0x19   :  { %68 = vmatpush.msra.mxu0 %v55_v6  ;;  %113 = vmatpush.msra.mxu1 %v55_v6 }
  0x1b   :  { %69 = vmatpush.msra.mxu0 %v54_v7  ;;  %114 = vmatpush.msra.mxu1 %v54_v7 }
  0x1d   :  { %70 = vmatpush.msra.mxu0 %v53_v8  ;;  %115 = vmatpush.msra.mxu1 %v53_v8 }
  0x1f   :  { %71 = vmatpush.msra.mxu0 %v52_v9  ;;  %116 = vmatpush.msra.mxu1 %v52_v9 }
  0x21   :  { %72 = vmatpush.msra.mxu0 %v51_v10  ;;  %117 = vmatpush.msra.mxu1 %v51_v10 }
  0x23   :  { %73 = vmatpush.msra.mxu0 %v50_v11  ;;  %118 = vmatpush.msra.mxu1 %v50_v11 }
  0x25   :  { %74 = vmatpush.msra.mxu0 %v49_v12  ;;  %119 = vmatpush.msra.mxu1 %v49_v12 }
  0x27   :  { %75 = vmatpush.msra.mxu0 %v48_v13  ;;  %120 = vmatpush.msra.mxu1 %v48_v13 }
  0x29   :  { %76 = vmatpush.msra.mxu0 %v47_v14  ;;  %121 = vmatpush.msra.mxu1 %v47_v14 }
  0x2b   :  { %77 = vmatpush.msra.mxu0 %v46_v15  ;;  %122 = vmatpush.msra.mxu1 %v46_v15 }
  0x2c   :  { %78 = vmatmul.f32.vlgmr.msra.gmra.mxu0 %v44_v16  ;;  %81 = vmatmul.f32.vlgmr.msra.gmra.mxu1 %v45_v17 }
  0xa9   :  { %v79_v18 = vpop.f32.mrf.mxu0  ;;  %v82_v19 = vpop.f32.mrf.mxu1 }
  0xaa   :  { %85 = vst [vmem:[#allocation7] sm:$0xff] %v79_v18 }
  0xab   :  { %86 = vst [vmem:[#allocation7 + $0x8] sm:$0xff] %v82_v19 }
  0xac   :  { %99 = dma.vmem_to_hbm [thread:$0]  %s92_s1, 256, %s94_s23, [#allocation4], %s207_s17, %s207_s17, %s208_s18  }
  0xad   :  { %204 = dma.done.wait [#allocation4], 256  }
  0xae   :  { %205 = vsyncadd [#allocation4], 4294967040 }
  0xaf   :  { %104 = vsyncpa [#allocation3], 1 }
  0xb0   :  { %105 = vsyncpa [#allocation6], 1 }
  0xb1   :  { %106 = vsyncpa [#allocation4], 1 }

</bundles_post_ra>
